<compile_context>
chip_gen: v7x
topology: tpu7x:2x2x1
jax: 0.10.0
libtpu: 0.0.40
codegen_flags: <defaults>
</compile_context>

<pallas_src>
import numpy as np
import jax
import jax.numpy as jnp
from jax.experimental import pallas as pl
from jax.experimental.pallas import tpu as pltpu

SIGMA = 10.0
LANE = 128          # padded feature / hidden width
EMBED_DIM = 10      # Fourier embedding size (embed_dim=10 -> W has 5 entries)
IN_DIM = 12         # 2 (x) + 10 (t embedding)
HID = 50
OUT_DIM = 2
PACK_DIM = 4        # packed input columns: [x0, x1, t, inv_std]
TILE_MAX = 2048     # batch-tile cap (well under scoped VMEM on all gens)


# ---------------------------------------------------------------------------
# Pallas kernel: one (TILE_B, *) batch tile per grid step.
# ---------------------------------------------------------------------------
def score_kernel(inp_ref, freq_ref, phase_ref,
                 w1_ref, b1_ref, w2_ref, b2_ref, w3_ref, b3_ref, o_ref):
    inp = inp_ref[...]                       # (TILE_B, 4)
    x0 = inp[:, 0:1]                         # (TILE_B, 1)
    x1 = inp[:, 1:2]
    t_col = inp[:, 2:3]
    inv_std = inp[:, 3:4]                    # precomputed 1/marginal_prob_std(t)

    # Gaussian Fourier features placed directly into lanes 2..11:
    #   lanes 2..6  -> sin(2*pi*t*W)   (phase 0)
    #   lanes 7..11 -> cos(2*pi*t*W)   (phase pi/2, cos(z)=sin(z+pi/2))
    # All other lanes have freq=0, phase=0 -> sin(0)=0, so no mask is needed.
    emb = jnp.sin(t_col * freq_ref[...] + phase_ref[...])        # (TILE_B, 128)

    # Layer 1: emb @ W1 covers embedding rows 2..11 (emb lanes 0/1 are exactly
    # zero); x contributes via two rank-1 broadcast-multiply-adds on W1 rows 0/1.
    pre1 = (jnp.dot(emb, w1_ref[...], preferred_element_type=jnp.float32)
            + x0 * w1_ref[0:1, :] + x1 * w1_ref[1:2, :] + b1_ref[...])
    h1 = jnp.tanh(pre1)
    h2 = jnp.tanh(jnp.dot(h1, w2_ref[...],
                          preferred_element_type=jnp.float32) + b2_ref[...])
    pred = jnp.dot(h2, w3_ref[...],
                   preferred_element_type=jnp.float32) + b3_ref[...]

    # Narrow (TILE_B, 2) writeback; divide-by-std as broadcast multiply.
    o_ref[...] = pred[:, :OUT_DIM] * inv_std


# ---------------------------------------------------------------------------
# Parameter construction (deterministic, matches nn.Module shapes).
# ---------------------------------------------------------------------------
def init_params(key):
    ks = jax.random.split(key, 7)
    return {
        "fourier_W": jax.random.normal(ks[0], (EMBED_DIM // 2,), jnp.float32),  # scale=1
        "W1": jax.random.normal(ks[1], (IN_DIM, HID), jnp.float32) / np.sqrt(IN_DIM),
        "b1": jax.random.normal(ks[2], (HID,), jnp.float32) * 0.1,
        "W2": jax.random.normal(ks[3], (HID, HID), jnp.float32) / np.sqrt(HID),
        "b2": jax.random.normal(ks[4], (HID,), jnp.float32) * 0.1,
        "W3": jax.random.normal(ks[5], (HID, OUT_DIM), jnp.float32) / np.sqrt(HID),
        "b3": jax.random.normal(ks[6], (OUT_DIM,), jnp.float32) * 0.1,
    }


def _pad2(w, rows, cols):
    out = jnp.zeros((rows, cols), jnp.float32)
    return out.at[: w.shape[0], : w.shape[1]].set(w)


def pad_params(params):
    """Pre-bake padded weights and Fourier constants once (not per forward)."""
    two_pi_W = 2.0 * np.pi * params["fourier_W"]                 # (5,)
    freq = jnp.zeros((1, LANE), jnp.float32)
    freq = freq.at[0, 2:7].set(two_pi_W).at[0, 7:12].set(two_pi_W)
    phase = jnp.zeros((1, LANE), jnp.float32).at[0, 7:12].set(np.pi / 2.0)
    return {
        "freq": freq,
        "phase": phase,
        "w1": _pad2(params["W1"], LANE, LANE),
        "b1": _pad2(params["b1"][None, :], 1, LANE),
        "w2": _pad2(params["W2"], LANE, LANE),
        "b2": _pad2(params["b2"][None, :], 1, LANE),
        "w3": _pad2(params["W3"], LANE, LANE),
        "b3": _pad2(params["b3"][None, :], 1, LANE),
    }


# ---------------------------------------------------------------------------
# Wrapper: pack narrow inputs, grid over batch tiles, weights resident in VMEM.
# ---------------------------------------------------------------------------
def _round_up(n, m):
    return ((n + m - 1) // m) * m


def score_model_forward(x, t, padded):
    B = x.shape[0]
    # Tile choice: big tiles (<= 2048 rows) amortize the ~0.35 us per-step
    # overhead; targeting >= 2 tiles when possible lets the "parallel" grid
    # axis shard across both TensorCores on v7x.  Small batches run one tile.
    tile_b = min(TILE_MAX, _round_up(max((B + 1) // 2, 4), 8))
    n_tiles = pl.cdiv(B, tile_b)
    Bp = n_tiles * tile_b

    # Precompute 1/marginal_prob_std(t) densely in the wrapper (cheap XLA op)
    # instead of per-tile exp+rsqrt on a 1-lane column inside the kernel.
    std = jnp.sqrt((SIGMA ** (2.0 * t) - 1.0) / 2.0 / np.log(SIGMA))
    packed = jnp.stack([x[:, 0], x[:, 1], t, 1.0 / std], axis=1)  # (B, 4)
    if Bp != B:
        packed = jnp.pad(packed, ((0, Bp - B), (0, 0)))           # pad rows = 0 (inv_std=0)

    in_spec = pl.BlockSpec((tile_b, PACK_DIM), lambda i: (i, 0))  # narrow input stream
    out_spec = pl.BlockSpec((tile_b, OUT_DIM), lambda i: (i, 0))  # narrow output stream
    w_spec = pl.BlockSpec((LANE, LANE), lambda i: (0, 0))         # resident weights
    v_spec = pl.BlockSpec((1, LANE), lambda i: (0, 0))            # resident row vectors

    out = pl.pallas_call(
        score_kernel,
        out_shape=jax.ShapeDtypeStruct((Bp, OUT_DIM), jnp.float32),
        grid=(n_tiles,),
        in_specs=[in_spec, v_spec, v_spec,
                  w_spec, v_spec, w_spec, v_spec, w_spec, v_spec],
        out_specs=out_spec,
        compiler_params=pltpu.CompilerParams(
            dimension_semantics=("parallel",),          # shards tiles across TCs
            vmem_limit_bytes=32 * 1024 * 1024),         # v5e default is only 16 MiB
    )(packed, padded["freq"], padded["phase"],
      padded["w1"], padded["b1"], padded["w2"], padded["b2"],
      padded["w3"], padded["b3"])

    return out[:B]


# ---------------------------------------------------------------------------
# Pure-JAX reference (mirrors the PyTorch forward exactly).
# ---------------------------------------------------------------------------
def reference_forward(x, t, params):
    W = params["fourier_W"]
    x_proj = t[:, None] * W[None, :] * 2.0 * np.pi
    t_embed = jnp.concatenate([jnp.sin(x_proj), jnp.cos(x_proj)], axis=-1)
    h = jnp.concatenate([x, t_embed], axis=1)
    h = jnp.tanh(h @ params["W1"] + params["b1"])
    h = jnp.tanh(h @ params["W2"] + params["b2"])
    pred = h @ params["W3"] + params["b3"]
    std = jnp.sqrt((SIGMA ** (2.0 * t) - 1.0) / 2.0 / np.log(SIGMA))
    return pred / std[:, None]


if __name__ == "__main__":
    key = jax.random.PRNGKey(0)
    kx, kt, kp = jax.random.split(key, 3)

    B = 4
    x = jax.random.normal(kx, (B, OUT_DIM), jnp.float32)            # samples in R^2
    t = jax.random.uniform(kt, (B,), jnp.float32, minval=0.05, maxval=1.0)
    params = init_params(kp)
    padded = pad_params(params)      # pre-baked constants, reused across calls

    out = score_model_forward(x, t, padded)
    out = jax.block_until_ready(out)

    ref = reference_forward(x, t, params)
    assert out.shape == (B, OUT_DIM)
    np.testing.assert_allclose(np.asarray(out), np.asarray(ref), rtol=1e-4, atol=1e-4)

    print("KERNEL_OK")
</pallas_src>

<mosaic_0001>
module attributes {stable_mosaic.version = 11 : i64} {
  func.func @score_kernel(%arg0: i32, %arg1: memref<8x4xf32, #tpu.memory_space<vmem>>, %arg2: memref<1x128xf32, #tpu.memory_space<vmem>>, %arg3: memref<1x128xf32, #tpu.memory_space<vmem>>, %arg4: memref<128x128xf32, #tpu.memory_space<vmem>>, %arg5: memref<1x128xf32, #tpu.memory_space<vmem>>, %arg6: memref<128x128xf32, #tpu.memory_space<vmem>>, %arg7: memref<1x128xf32, #tpu.memory_space<vmem>>, %arg8: memref<128x128xf32, #tpu.memory_space<vmem>>, %arg9: memref<1x128xf32, #tpu.memory_space<vmem>>, %arg10: memref<8x2xf32, #tpu.memory_space<vmem>>) attributes {dimension_semantics = [#tpu.dimension_semantics<parallel>], iteration_bounds = array<i64: 1>, scalar_prefetch = 0 : i64, scratch_operands = 0 : i64, tpu.core_type = #tpu.core_type<tc>, window_params = [{transform_indices = @transform_0, window_bounds = array<i64: 8, 4>}, {pipeline_mode = #tpu.pipeline_mode<synchronous>, transform_indices = @transform_1, window_bounds = array<i64: 1, 128>}, {pipeline_mode = #tpu.pipeline_mode<synchronous>, transform_indices = @transform_2, window_bounds = array<i64: 1, 128>}, {pipeline_mode = #tpu.pipeline_mode<synchronous>, transform_indices = @transform_3, window_bounds = array<i64: 128, 128>}, {pipeline_mode = #tpu.pipeline_mode<synchronous>, transform_indices = @transform_4, window_bounds = array<i64: 1, 128>}, {pipeline_mode = #tpu.pipeline_mode<synchronous>, transform_indices = @transform_5, window_bounds = array<i64: 128, 128>}, {pipeline_mode = #tpu.pipeline_mode<synchronous>, transform_indices = @transform_6, window_bounds = array<i64: 1, 128>}, {pipeline_mode = #tpu.pipeline_mode<synchronous>, transform_indices = @transform_7, window_bounds = array<i64: 128, 128>}, {pipeline_mode = #tpu.pipeline_mode<synchronous>, transform_indices = @transform_8, window_bounds = array<i64: 1, 128>}, {transform_indices = @transform_9, window_bounds = array<i64: 8, 2>}]} {
    %c0 = arith.constant 0 : index
    %c0_0 = arith.constant 0 : index
    %0 = vector.load %arg1[%c0, %c0_0] : memref<8x4xf32, #tpu.memory_space<vmem>>, vector<8x4xf32>
    %1 = vector.extract_strided_slice %0 {offsets = [0, 0], sizes = [8, 1], strides = [1, 1]} : vector<8x4xf32> to vector<8x1xf32>
    %2 = vector.extract_strided_slice %0 {offsets = [0, 1], sizes = [8, 1], strides = [1, 1]} : vector<8x4xf32> to vector<8x1xf32>
    %3 = vector.extract_strided_slice %0 {offsets = [0, 2], sizes = [8, 1], strides = [1, 1]} : vector<8x4xf32> to vector<8x1xf32>
    %4 = vector.extract_strided_slice %0 {offsets = [0, 3], sizes = [8, 1], strides = [1, 1]} : vector<8x4xf32> to vector<8x1xf32>
    %c0_1 = arith.constant 0 : index
    %c0_2 = arith.constant 0 : index
    %5 = vector.load %arg2[%c0_1, %c0_2] : memref<1x128xf32, #tpu.memory_space<vmem>>, vector<1x128xf32>
    %6 = vector.broadcast %3 : vector<8x1xf32> to vector<8x128xf32>
    %7 = vector.broadcast %5 : vector<1x128xf32> to vector<8x128xf32>
    %8 = arith.mulf %6, %7 : vector<8x128xf32>
    %c0_3 = arith.constant 0 : index
    %c0_4 = arith.constant 0 : index
    %9 = vector.load %arg3[%c0_3, %c0_4] : memref<1x128xf32, #tpu.memory_space<vmem>>, vector<1x128xf32>
    %10 = vector.broadcast %9 : vector<1x128xf32> to vector<8x128xf32>
    %11 = arith.addf %8, %10 : vector<8x128xf32>
    %12 = math.sin %11 : vector<8x128xf32>
    %c0_5 = arith.constant 0 : index
    %c0_6 = arith.constant 0 : index
    %13 = vector.load %arg4[%c0_5, %c0_6] : memref<128x128xf32, #tpu.memory_space<vmem>>, vector<128x128xf32>
    %cst = arith.constant dense<0.000000e+00> : vector<8x128xf32>
    %14 = tpu.matmul %12, %13, %cst {dimension_numbers = #tpu.dot_dimension_numbers<[1], [0], [0], [1], [0, 0, 1, 1], [], []>} : vector<8x128xf32>, vector<128x128xf32>, vector<8x128xf32> -> vector<8x128xf32>
    %c0_7 = arith.constant 0 : index
    %c0_8 = arith.constant 0 : index
    %15 = vector.load %arg4[%c0_7, %c0_8] : memref<128x128xf32, #tpu.memory_space<vmem>>, vector<1x128xf32>
    %16 = vector.broadcast %1 : vector<8x1xf32> to vector<8x128xf32>
    %17 = vector.broadcast %15 : vector<1x128xf32> to vector<8x128xf32>
    %18 = arith.mulf %16, %17 : vector<8x128xf32>
    %19 = arith.addf %14, %18 : vector<8x128xf32>
    %c1 = arith.constant 1 : index
    %c0_9 = arith.constant 0 : index
    %20 = vector.load %arg4[%c1, %c0_9] : memref<128x128xf32, #tpu.memory_space<vmem>>, vector<1x128xf32>
    %21 = vector.broadcast %2 : vector<8x1xf32> to vector<8x128xf32>
    %22 = vector.broadcast %20 : vector<1x128xf32> to vector<8x128xf32>
    %23 = arith.mulf %21, %22 : vector<8x128xf32>
    %24 = arith.addf %19, %23 : vector<8x128xf32>
    %c0_10 = arith.constant 0 : index
    %c0_11 = arith.constant 0 : index
    %25 = vector.load %arg5[%c0_10, %c0_11] : memref<1x128xf32, #tpu.memory_space<vmem>>, vector<1x128xf32>
    %26 = vector.broadcast %25 : vector<1x128xf32> to vector<8x128xf32>
    %27 = arith.addf %24, %26 : vector<8x128xf32>
    %28 = math.tanh %27 : vector<8x128xf32>
    %c0_12 = arith.constant 0 : index
    %c0_13 = arith.constant 0 : index
    %29 = vector.load %arg6[%c0_12, %c0_13] : memref<128x128xf32, #tpu.memory_space<vmem>>, vector<128x128xf32>
    %cst_14 = arith.constant dense<0.000000e+00> : vector<8x128xf32>
    %30 = tpu.matmul %28, %29, %cst_14 {dimension_numbers = #tpu.dot_dimension_numbers<[1], [0], [0], [1], [0, 0, 1, 1], [], []>} : vector<8x128xf32>, vector<128x128xf32>, vector<8x128xf32> -> vector<8x128xf32>
    %c0_15 = arith.constant 0 : index
    %c0_16 = arith.constant 0 : index
    %31 = vector.load %arg7[%c0_15, %c0_16] : memref<1x128xf32, #tpu.memory_space<vmem>>, vector<1x128xf32>
    %32 = vector.broadcast %31 : vector<1x128xf32> to vector<8x128xf32>
    %33 = arith.addf %30, %32 : vector<8x128xf32>
    %34 = math.tanh %33 : vector<8x128xf32>
    %c0_17 = arith.constant 0 : index
    %c0_18 = arith.constant 0 : index
    %35 = vector.load %arg8[%c0_17, %c0_18] : memref<128x128xf32, #tpu.memory_space<vmem>>, vector<128x128xf32>
    %cst_19 = arith.constant dense<0.000000e+00> : vector<8x128xf32>
    %36 = tpu.matmul %34, %35, %cst_19 {dimension_numbers = #tpu.dot_dimension_numbers<[1], [0], [0], [1], [0, 0, 1, 1], [], []>} : vector<8x128xf32>, vector<128x128xf32>, vector<8x128xf32> -> vector<8x128xf32>
    %c0_20 = arith.constant 0 : index
    %c0_21 = arith.constant 0 : index
    %37 = vector.load %arg9[%c0_20, %c0_21] : memref<1x128xf32, #tpu.memory_space<vmem>>, vector<1x128xf32>
    %38 = vector.broadcast %37 : vector<1x128xf32> to vector<8x128xf32>
    %39 = arith.addf %36, %38 : vector<8x128xf32>
    %40 = vector.extract_strided_slice %39 {offsets = [0, 0], sizes = [8, 2], strides = [1, 1]} : vector<8x128xf32> to vector<8x2xf32>
    %41 = vector.broadcast %4 : vector<8x1xf32> to vector<8x2xf32>
    %42 = arith.mulf %40, %41 : vector<8x2xf32>
    %c0_22 = arith.constant 0 : index
    %c0_23 = arith.constant 0 : index
    %43 = vector.load %arg10[%c0_22, %c0_23] : memref<8x2xf32, #tpu.memory_space<vmem>>, vector<8x2xf32>
    tpu.vector_store %arg10[%c0_22, %c0_23], %42 {strides = array<i32>} : memref<8x2xf32, #tpu.memory_space<vmem>>, vector<8x2xf32>,
    return
  }
  func.func @transform_0(%arg0: i32) -> (i32, i32) {
    %c0_i32 = arith.constant 0 : i32
    %c0_i32_0 = arith.constant 0 : i32
    return %arg0, %c0_i32 : i32, i32
  }
  func.func @transform_1(%arg0: i32) -> (i32, i32) {
    %c0_i32 = arith.constant 0 : i32
    %c0_i32_0 = arith.constant 0 : i32
    %c0_i32_1 = arith.constant 0 : i32
    return %c0_i32, %c0_i32_0 : i32, i32
  }
  func.func @transform_2(%arg0: i32) -> (i32, i32) {
    %c0_i32 = arith.constant 0 : i32
    %c0_i32_0 = arith.constant 0 : i32
    %c0_i32_1 = arith.constant 0 : i32
    return %c0_i32, %c0_i32_0 : i32, i32
  }
  func.func @transform_3(%arg0: i32) -> (i32, i32) {
    %c0_i32 = arith.constant 0 : i32
    %c0_i32_0 = arith.constant 0 : i32
    %c0_i32_1 = arith.constant 0 : i32
    return %c0_i32, %c0_i32_0 : i32, i32
  }
  func.func @transform_4(%arg0: i32) -> (i32, i32) {
    %c0_i32 = arith.constant 0 : i32
    %c0_i32_0 = arith.constant 0 : i32
    %c0_i32_1 = arith.constant 0 : i32
    return %c0_i32, %c0_i32_0 : i32, i32
  }
  func.func @transform_5(%arg0: i32) -> (i32, i32) {
    %c0_i32 = arith.constant 0 : i32
    %c0_i32_0 = arith.constant 0 : i32
    %c0_i32_1 = arith.constant 0 : i32
    return %c0_i32, %c0_i32_0 : i32, i32
  }
  func.func @transform_6(%arg0: i32) -> (i32, i32) {
    %c0_i32 = arith.constant 0 : i32
    %c0_i32_0 = arith.constant 0 : i32
    %c0_i32_1 = arith.constant 0 : i32
    return %c0_i32, %c0_i32_0 : i32, i32
  }
  func.func @transform_7(%arg0: i32) -> (i32, i32) {
    %c0_i32 = arith.constant 0 : i32
    %c0_i32_0 = arith.constant 0 : i32
    %c0_i32_1 = arith.constant 0 : i32
    return %c0_i32, %c0_i32_0 : i32, i32
  }
  func.func @transform_8(%arg0: i32) -> (i32, i32) {
    %c0_i32 = arith.constant 0 : i32
    %c0_i32_0 = arith.constant 0 : i32
    %c0_i32_1 = arith.constant 0 : i32
    return %c0_i32, %c0_i32_0 : i32, i32
  }
  func.func @transform_9(%arg0: i32) -> (i32, i32) {
    %c0_i32 = arith.constant 0 : i32
    %c0_i32_0 = arith.constant 0 : i32
    return %arg0, %c0_i32 : i32, i32
  }
}

</mosaic_0001>

<bundles_post_ra>
// kernel: tpu_custom_call.1
= control target key start
LH: loop header
LB: loop body
LE: loop exit
PB: predicated region body
PF: predicated region fallthrough
CT: control target
= control target key end

     0   :  { %14 = vsyncpa [#allocation3], 0  ;;  %s1057_s0 = inlined_call_operand.vmem [shape: f32[8,4], index: 0, kind: input, shape index: {}]   ;;  %s1058_s1 = inlined_call_operand.vmem [shape: f32[1,128], index: 1, kind: input, shape index: {}]   ;;  %s1059_s2 = inlined_call_operand.vmem [shape: f32[1,128], index: 2, kind: input, shape index: {}]   ;;  %s1060_s3 = inlined_call_operand.hbm [shape: f32[128,128], index: 3, kind: input, shape index: {}]   ;;  %s1061_s4 = inlined_call_operand.vmem [shape: f32[1,128], index: 4, kind: input, shape index: {}]   ;;  %s1062_s5 = inlined_call_operand.hbm [shape: f32[128,128], index: 5, kind: input, shape index: {}]   ;;  %s1063_s6 = inlined_call_operand.vmem [shape: f32[1,128], index: 6, kind: input, shape index: {}]   ;;  %s1064_s7 = inlined_call_operand.hbm [shape: f32[128,128], index: 7, kind: input, shape index: {}]   ;;  %s1065_s8 = inlined_call_operand.vmem [shape: f32[1,128], index: 8, kind: input, shape index: {}]   ;;  %s1066_s9 = inlined_call_operand.vmem [shape: f32[8,2], index: 9, kind: output, shape index: {}]  }
   0x1   :  { %15 = vsyncpa [#allocation5], 0  ;;  %s859_s30 = smov [#allocation4]   ;;  %s860_s11 = smov [#allocation2]  }
   0x2   :  { %s41_s10 = sshll.u32 %s859_s30, 4  ;;  %s27_s12 = sshll.u32 %s860_s11, 4  ;;  %s42_s10 = int_to_ptr.vmem [resolvable:$true] %s41_s10  ;;  %s927_s12 = int_to_ptr.vmem [resolvable:$true] %s27_s12 }
   0x3   :  { %s789_s15 = scalar_lea.hbm %s1062_s5, 2048 }
   0x4   :  { %p790_p0 = scmp.ne.s32.totalorder %s1062_s5, %s789_s15  ;;  %p793_p1 = scmp.lt.u32.totalorder %s789_s15, %s1062_s5 }
   0x6   :  { %p795_p2 = pnand %p793_p1, %p790_p0 }
   0x8   :  { %798 = shalt.err (!%p795_p2)
}
   0x9   :  { %s799_s20 = scalar_lea.vmem %s42_s10, 2048  ;;  %p804_p4 = scmp.lt.s32.totalorder %s42_s10, %s42_s10 }
   0xa   :  { %p800_p3 = scmp.ne.s32.totalorder %s42_s10, %s799_s20  ;;  %p805_p5 = scmp.lt.s32.totalorder %s799_s20, %s799_s20 }
   0xc   :  { %p806_p6 = por %p805_p5, %p804_p4 }
   0xe   :  { %p807_p7 = pnand %p806_p6, %p800_p3 }
  0x10   :  { %810 = shalt.err (!%p807_p7)
}
  0x11   :  { %s861_s21 = smov 128   ;;  %s862_s22 = smov 8  }
  0x12   :  { %47 = dma.hbm_to_vmem [thread:$0]  %s1062_s5, 2048, %s42_s10, [#allocation5], %s861_s21, %s861_s21, %s862_s22  }
  0x13   :  { %s811_s27 = scalar_lea.hbm %s1060_s3, 2048 }
  0x14   :  { %p812_p8 = scmp.ne.s32.totalorder %s1060_s3, %s811_s27  ;;  %p815_p9 = scmp.lt.u32.totalorder %s811_s27, %s1060_s3 }
  0x16   :  { %p817_p10 = pnand %p815_p9, %p812_p8 }
  0x18   :  { %820 = shalt.err (!%p817_p10)
}
  0x19   :  { %s821_s13 = scalar_lea.vmem %s927_s12, 2048  ;;  %p826_p12 = scmp.lt.s32.totalorder %s927_s12, %s927_s12 }
  0x1a   :  { %p822_p11 = scmp.ne.s32.totalorder %s927_s12, %s821_s13  ;;  %p827_p13 = scmp.lt.s32.totalorder %s821_s13, %s821_s13 }
  0x1c   :  { %p828_p0 = por %p827_p13, %p826_p12 }
  0x1e   :  { %p829_p1 = pnand %p828_p0, %p822_p11 }
  0x20   :  { %832 = shalt.err (!%p829_p1)
}
  0x21   :  { %33 = dma.hbm_to_vmem [thread:$0]  %s1060_s3, 2048, %s927_s12, [#allocation3], %s861_s21, %s861_s21, %s862_s22  }
  0x22   :  { %s863_s14 = smov [#allocation6]   ;;  %s833_s18 = scalar_lea.hbm %s1064_s7, 2048 }
  0x23   :  { %s55_s15 = sshll.u32 %s863_s14, 4  ;;  %p834_p2 = scmp.ne.s32.totalorder %s1064_s7, %s833_s18  ;;  %s56_s15 = int_to_ptr.vmem [resolvable:$true] %s55_s15 }
  0x24   :  { %p837_p3 = scmp.lt.u32.totalorder %s833_s18, %s1064_s7 }
  0x26   :  { %p839_p4 = pnand %p837_p3, %p834_p2 }
  0x28   :  { %842 = shalt.err (!%p839_p4)
}
  0x29   :  { %s843_s25 = scalar_lea.vmem %s56_s15, 2048  ;;  %p848_p6 = scmp.lt.s32.totalorder %s56_s15, %s56_s15 }
  0x2a   :  { %p844_p5 = scmp.ne.s32.totalorder %s56_s15, %s843_s25  ;;  %p849_p7 = scmp.lt.s32.totalorder %s843_s25, %s843_s25 }
  0x2c   :  { %p850_p8 = por %p849_p7, %p848_p6 }
  0x2e   :  { %p851_p9 = pnand %p850_p8, %p844_p5 }
  0x30   :  { %854 = shalt.err (!%p851_p9)
}
  0x31   :  { %61 = dma.hbm_to_vmem [thread:$0]  %s1064_s7, 2048, %s56_s15, [#allocation5], %s861_s21, %s861_s21, %s862_s22  }
  0x32   :  { %855 = dma.done.wait [#allocation3], 2048  }
  0x33   :  { %856 = vsyncadd [#allocation3], 4294965248 }
  0x34   :  { %857 = dma.done.wait [#allocation5], 4096  }
  0x35   :  { %858 = vsyncadd [#allocation5], 4294963200  ;;  %v864_v0 = vmov 2   ;;  %v982_v1 = vld [vmem:[%s1057_s0] sm:$0xff]  ;;  %v200_v3 = vld [vmem:[#allocation2 + $0x8] sm:$0xff]  ;;  %v865_v5 = vmov 0.0|0.0  }
  0x36   :  { %776 = vset.pattern.permute.xlu0 %v864_v0  ;;  %v199_v2 = vld [vmem:[#allocation2] sm:$0xff]  ;;  %v201_v4 = vld [vmem:[#allocation2 + $0x10] sm:$0xff]  ;;  %682 = vmatprep.subr.bf16.mxu0 %v865_v5  ;;  %v202_v7 = vld [vmem:[#allocation2 + $0x18] sm:$0xff]  ;;  %vm866_vm0 = vmmov 0   ;;  %v867_v8 = vmov 0.0   ;;  %v868_v31 = vmov 0  }
  0x37   :  { %77 = vperm.xlu0 %776, %v982_v1   ;;  %v683_v6 = vpack.c.bf16 %v200_v3, %v199_v2  ;;  %609 = vmatprep.mubr.msk.f32.mxu0 %vm866_vm0, %v867_v8  ;;  %v686_v9 = vpack.c.bf16 %v202_v7, %v201_v4  ;;  %v203_v10 = vld [vmem:[#allocation2 + $0x20] sm:$0xff]  ;;  %v204_v11 = vld [vmem:[#allocation2 + $0x28] sm:$0xff]  ;;  %v205_v13 = vld [vmem:[#allocation2 + $0x30] sm:$0xff]  ;;  %v869_v32 = vmov 1   ;;  %v870_v58 = vmov 2102212464  }
  0x38   :  { %706 = vmatprep.subr.bf16.mxu1 %v865_v5  ;;  %644 = vmatprep.mubr.msk.f32.mxu1 %vm866_vm0, %v867_v8  ;;  %v689_v12 = vpack.c.bf16 %v204_v11, %v203_v10  ;;  %v206_v14 = vld [vmem:[#allocation2 + $0x38] sm:$0xff]  ;;  %v207_v16 = vld [vmem:[#allocation2 + $0x40] sm:$0xff]  ;;  %v208_v17 = vld [vmem:[#allocation2 + $0x48] sm:$0xff]  ;;  %v871_v60 = vmov 920167782   ;;  %vm507_vm14 = vcmask 15360  }
  0x39   :  { %684 = vmatpush3.bf16.msra.mxu0 %v683_v6  ;;  %v692_v15 = vpack.c.bf16 %v206_v14, %v205_v13  ;;  %v695_v18 = vpack.c.bf16 %v208_v17, %v207_v16  ;;  %v209_v19 = vld [vmem:[#allocation2 + $0x50] sm:$0xff]  ;;  %v210_v20 = vld [vmem:[#allocation2 + $0x58] sm:$0xff]  ;;  %v211_v22 = vld [vmem:[#allocation2 + $0x60] sm:$0xff]  ;;  %778 = vset.pattern.permute.xlu1 %v869_v32  ;;  %v872_v0 = vmov 1326507024  }
  0x3a   :  { %685 = vmatprep.subr.bf16.mxu0 %v865_v5  ;;  %v698_v21 = vpack.c.bf16 %v210_v20, %v209_v19  ;;  %v212_v23 = vld [vmem:[#allocation2 + $0x68] sm:$0xff]  ;;  %v213_v25 = vld [vmem:[#allocation2 + $0x70] sm:$0xff]  ;;  %v214_v26 = vld [vmem:[#allocation2 + $0x78] sm:$0xff]  ;;  %297 = vperm.xlu1 %778, %v982_v1   ;;  %v873_v3 = vmov 683565275  }
  0x3b   :  { %v701_v24 = vpack.c.bf16 %v212_v23, %v211_v22  ;;  %v704_v27 = vpack.c.bf16 %v214_v26, %v213_v25  ;;  %v315_v28 = vld [vmem:[#allocation4] sm:$0xff]  ;;  %v316_v29 = vld [vmem:[#allocation4 + $0x8] sm:$0xff]  ;;  %v317_v30 = vld [vmem:[#allocation4 + $0x10] sm:$0xff]  ;;  %777 = vset.pattern.permute.xlu0 %v868_v31  ;;  %v874_v6 = vmov 2475754826  }
  0x3c   :  { %v707_v33 = vpack.c.bf16 %v316_v29, %v315_v28  ;;  %v318_v34 = vld [vmem:[#allocation4 + $0x18] sm:$0xff]  ;;  %217 = vperm.xlu0 %777, %v982_v1   ;;  %v319_v36 = vld [vmem:[#allocation4 + $0x20] sm:$0xff]  ;;  %v320_v37 = vld [vmem:[#allocation4 + $0x28] sm:$0xff]  ;;  %v875_v10 = vmov 2131351028  }
  0x3d   :  { %687 = vmatpush3.bf16.msra.mxu0 %v686_v9  ;;  %v710_v35 = vpack.c.bf16 %v318_v34, %v317_v30  ;;  %v713_v38 = vpack.c.bf16 %v320_v37, %v319_v36  ;;  %v321_v39 = vld [vmem:[#allocation4 + $0x30] sm:$0xff]  ;;  %v322_v40 = vld [vmem:[#allocation4 + $0x38] sm:$0xff]  ;;  %v515_v42 = vld [vmem:[%s1058_s1] ss:$0 sm:$0xff] }
  0x3e   :  { %688 = vmatprep.subr.bf16.mxu0 %v865_v5  ;;  %708 = vmatpush3.bf16.msra.mxu1 %v707_v33  ;;  %v716_v41 = vpack.c.bf16 %v322_v40, %v321_v39  ;;  %v516_v43 = vld [vmem:[%s1059_s2] ss:$0 sm:$0xff] }
  0x3f   :  { %709 = vmatprep.subr.bf16.mxu1 %v865_v5 }
  0x41   :  { %690 = vmatpush3.bf16.msra.mxu0 %v689_v12 }
  0x42   :  { %691 = vmatprep.subr.bf16.mxu0 %v865_v5  ;;  %711 = vmatpush3.bf16.msra.mxu1 %v710_v35 }
  0x43   :  { %712 = vmatprep.subr.bf16.mxu1 %v865_v5 }
  0x45   :  { %693 = vmatpush3.bf16.msra.mxu0 %v692_v15 }
  0x46   :  { %694 = vmatprep.subr.bf16.mxu0 %v865_v5  ;;  %714 = vmatpush3.bf16.msra.mxu1 %v713_v38 }
  0x47   :  { %715 = vmatprep.subr.bf16.mxu1 %v865_v5 }
  0x49   :  { %696 = vmatpush3.bf16.msra.mxu0 %v695_v18 }
  0x4a   :  { %697 = vmatprep.subr.bf16.mxu0 %v865_v5  ;;  %717 = vmatpush3.bf16.msra.mxu1 %v716_v41 }
  0x4b   :  { %718 = vmatprep.subr.bf16.mxu1 %v865_v5 }
  0x4d   :  { %699 = vmatpush3.bf16.msra.mxu0 %v698_v21 }
  0x4e   :  { %700 = vmatprep.subr.bf16.mxu0 %v865_v5 }
  0x51   :  { %702 = vmatpush3.bf16.msra.mxu0 %v701_v24 }
  0x52   :  { %703 = vmatprep.subr.bf16.mxu0 %v865_v5 }
  0x55   :  { %705 = vmatpush3.bf16.msra.mxu0 %v704_v27 }
  0x56   :  { %730 = vmatprep.subr.bf16.mxu0 %v865_v5 }
  0xb6   :  { %v78_v44 = vpop.permute.xlu0 %77 }
  0xb7   :  { %v86_v45 = vmul.f32 %v515_v42, %v78_v44 }
  0xb9   :  { %v1011_v46 = vadd.f32 %v516_v43, %v86_v45 }
  0xbb   :  { %v98_v47 = vand.u32 2139095040, %v1011_v46  ;;  %v95_v48 = vand.u32 2147483647, %v1011_v46  ;;  %vm97_vm8 = vcmp.lt.s32.totalorder %v1011_v46, 0  ;;  %vm187_vm13 = vweird.f32 %v1011_v46 }
  0xbd   :  { %v99_v49 = vshrl.u32 %v98_v47, 23  ;;  %v102_v51 = vand.u32 8388607, %v95_v48  ;;  %vm96_vm9 = vcmp.le.f32.partialorder %v95_v48, 0.7853982 }
  0xbf   :  { %v517_v50 = vadd.s32 4294967169, %v99_v49  ;;  %v103_v54 = vor.u32 8388608, %v102_v51 }
  0xc1   :  { %v105_v52 = vadd.s32 1, %v517_v50  ;;  %v143_v62 = vshll.u32 %v103_v54, 8 }
  0xc3   :  { %vm106_vm1 = vcmp.gt.s32.totalorder %v105_v52, 0 }
  0xc4   :  { %v107_v53 = vsel %vm106_vm1, %v105_v52, 0 }
  0xc5   :  { %v109_v55 = vand.u32 31, %v107_v53  ;;  %v108_v56 = vshrl.u32 %v107_v53, 5 }
  0xc7   :  { %v110_v57 = vsub.s32 32, %v109_v55  ;;  %v121_v59 = vshll.u32 %v870_v58, %v109_v55  ;;  %v124_v61 = vshll.u32 %v871_v60, %v109_v55  ;;  %v112_v4 = vshll.u32 %v873_v3, %v109_v55 }
  0xc8   :  { %v115_v9 = vshll.u32 %v874_v6, %v109_v55  ;;  %v118_v12 = vshll.u32 %v875_v10, %v109_v55  ;;  %vm130_vm2 = vcmp.lt.s32.totalorder %v108_v56, 4  ;;  %vm127_vm3 = vcmp.lt.s32.totalorder %v108_v56, 1 }
  0xc9   :  { %v122_v63 = vshrl.u32 %v871_v60, %v110_v57  ;;  %v125_v2 = vshrl.u32 %v872_v0, %v110_v57  ;;  %v113_v7 = vshrl.u32 %v874_v6, %v110_v57  ;;  %v116_v11 = vshrl.u32 %v875_v10, %v110_v57 }
  0xca   :  { %v119_v13 = vshrl.u32 %v870_v58, %v110_v57  ;;  %v111_v17 = vshrl.u32 %v873_v3, %v110_v57  ;;  %vm128_vm4 = vcmp.lt.s32.totalorder %v108_v56, 2  ;;  %vm129_vm5 = vcmp.lt.s32.totalorder %v108_v56, 3 }
  0xcb   :  { %v123_v14 = vor.u32 %v122_v63, %v121_v59  ;;  %v126_v15 = vor.u32 %v125_v2, %v124_v61  ;;  %v114_v16 = vor.u32 %v113_v7, %v112_v4  ;;  %v117_v18 = vor.u32 %v116_v11, %v115_v9 }
  0xcc   :  { %v120_v19 = vor.u32 %v119_v13, %v118_v12 }
  0xcd   :  { %v136_v20 = vsel %vm130_vm2, %v123_v14, 920167782  ;;  %v140_v21 = vsel %vm130_vm2, %v126_v15, 1326507024  ;;  %v135_v23 = vsel %vm127_vm3, %v114_v16, %v117_v18  ;;  %v131_v26 = vsel %vm127_vm3, %v111_v17, %v114_v16  ;;  %v323_v17 = vld [vmem:[#allocation4 + $0x40] sm:$0xff] }
  0xce   :  { %v132_v22 = vsel %vm130_vm2, %v120_v19, 2102212464  ;;  %v137_v24 = vsel %vm129_vm5, %v120_v19, %v136_v20  ;;  %v139_v25 = vsel %vm127_vm3, %v117_v18, %v120_v19  ;;  %v141_v29 = vsel %vm129_vm5, %v123_v14, %v140_v21  ;;  %v325_v20 = vld [vmem:[#allocation4 + $0x50] sm:$0xff]  ;;  %v326_v21 = vld [vmem:[#allocation4 + $0x58] sm:$0xff] }
  0xcf   :  { %v133_v27 = vsel %vm129_vm5, %v117_v18, %v132_v22  ;;  %v138_v28 = vsel %vm128_vm4, %v135_v23, %v137_v24  ;;  %v142_v30 = vsel %vm128_vm4, %v139_v25, %v141_v29  ;;  %v324_v18 = vld [vmem:[#allocation4 + $0x48] sm:$0xff]  ;;  %v722_v22 = vpack.c.bf16 %v326_v21, %v325_v20  ;;  %v327_v23 = vld [vmem:[#allocation4 + $0x60] sm:$0xff]  ;;  %v411_v29 = vld [vmem:[#allocation6 + $0x10] sm:$0xff] }
  0xd0   :  { %v1017_v31 = vmul.u32.u64.low %v143_v62, %v138_v28  ;;  %v1018_v32 = vmul.u32.u64.high %v143_v62, %v138_v28, %v1017_v31  ;;  %v1020_v33 = vmul.u32.u64.low %v143_v62, %v142_v30  ;;  %v1021_v34 = vmul.u32.u64.high %v143_v62, %v142_v30, %v1020_v33  ;;  %v328_v24 = vld [vmem:[#allocation4 + $0x68] sm:$0xff] }
  0xd1   :  { %v134_v35 = vsel %vm128_vm4, %v131_v26, %v133_v27  ;;  %v719_v19 = vpack.c.bf16 %v324_v18, %v323_v17  ;;  %v725_v25 = vpack.c.bf16 %v328_v24, %v327_v23  ;;  %v330_v26 = vld [vmem:[#allocation4 + $0x78] sm:$0xff]  ;;  %v410_v28 = vld [vmem:[#allocation6 + $0x8] sm:$0xff]  ;;  %v413_v33 = vld [vmem:[#allocation6 + $0x20] sm:$0xff] }
  0xd2   :  { %v153_v36 = vadd.s32 1, %v1018_v32  ;;  %v150_v37 = vmul.u32 %v143_v62, %v134_v35  ;;  %vm152_vm6 = vc.u32 %v1021_v34, %v1017_v31  ;;  %v151_v51 = vadd.s32 %v1017_v31, %v1021_v34  ;;  %v412_v31 = vld [vmem:[#allocation6 + $0x18] sm:$0xff]  ;;  %v414_v34 = vld [vmem:[#allocation6 + $0x28] sm:$0xff] }
  0xd3   :  { %720 = vmatpush3.bf16.msra.mxu1 %v719_v19  ;;  %v737_v35 = vpack.c.bf16 %v414_v34, %v413_v33 }
  0xd4   :  { %v154_v38 = vsel %vm152_vm6, %v153_v36, %v1018_v32  ;;  %721 = vmatprep.subr.bf16.mxu1 %v865_v5  ;;  %v734_v32 = vpack.c.bf16 %v412_v31, %v411_v29  ;;  %v415_v36 = vld [vmem:[#allocation6 + $0x30] sm:$0xff] }
  0xd5   :  { %v155_v39 = vadd.s32 %v154_v38, %v150_v37  ;;  %v416_v37 = vld [vmem:[#allocation6 + $0x38] sm:$0xff] }
  0xd6   :  { %v740_v38 = vpack.c.bf16 %v416_v37, %v415_v36 }
  0xd7   :  { %v156_v40 = vadd.s32 536870912, %v155_v39  ;;  %723 = vmatpush3.bf16.msra.mxu1 %v722_v22 }
  0xd8   :  { %724 = vmatprep.subr.bf16.mxu1 %v865_v5 }
  0xd9   :  { %v157_v41 = vshrl.u32 %v156_v40, 30  ;;  %v418_v40 = vld [vmem:[#allocation6 + $0x48] sm:$0xff] }
  0xdb   :  { %v158_v42 = vshll.u32 %v157_v41, 30  ;;  %v181_v63 = vsub.s32 4, %v157_v41  ;;  %726 = vmatpush3.bf16.msra.mxu1 %v725_v25 }
  0xdc   :  { %727 = vmatprep.subr.bf16.mxu1 %v865_v5 }
  0xdd   :  { %v159_v43 = vsub.s32 %v155_v39, %v158_v42  ;;  %v182_v3 = vsel %vm97_vm8, %v181_v63, %v157_v41  ;;  %v417_v39 = vld [vmem:[#allocation6 + $0x40] sm:$0xff]  ;;  %v423_v63 = vld [vmem:[#allocation6 + $0x70] sm:$0xff] }
  0xde   :  { %v184_v6 = vsel %vm96_vm9, 0, %v182_v3  ;;  %v743_v41 = vpack.c.bf16 %v418_v40, %v417_v39  ;;  %v521_v42 = vld [vmem:[#allocation2] ss:$0 sm:$0xff]  ;;  %v876_v3 = vmov 3  }
  0xdf   :  { %v161_v44 = vsub.s32 0, %v159_v43  ;;  %v188_v7 = vadd.s32 3, %v184_v6  ;;  %779 = vset.pattern.permute.xlu1 %v876_v3  ;;  %780 = vset.pattern.permute.xlu0 %v876_v3 }
  0xe0   :  { %503 = vperm.xlu1 %779, %v982_v1  }
  0xe1   :  { %v518_v45 = vmin.u32 %v161_v44, %v159_v43  ;;  %v189_v9 = vand.u32 3, %v188_v7  ;;  %v522_v44 = vld [vmem:[#allocation2 + $0x1] ss:$0 sm:$0xff] }
  0xe3   :  { %v163_v47 = vclz %v518_v45  ;;  %vm194_vm10 = vcmp.eq.s32.totalorder %v189_v9, 2  ;;  %vm191_vm11 = vcmp.eq.s32.totalorder %v189_v9, 0  ;;  %vm190_vm12 = vcmp.lt.s32.totalorder %v189_v9, 2  ;;  %v298_v45 = vpop.permute.xlu1 %297 }
  0xe5   :  { %v519_v49 = vadd.s32 4294967294, %v163_v47 }
  0xe7   :  { %vm520_vm7 = vcmp.lt.s32.totalorder %v519_v49, 0 }
  0xe8   :  { %v166_v50 = vsel %vm520_vm7, 0, %v519_v49  ;;  %v304_v49 = vmul.f32 %v522_v44, %v298_v45 }
  0xe9   :  { %v167_v52 = vsub.s32 32, %v166_v50  ;;  %v171_v53 = vsub.s32 4294967266, %v166_v50  ;;  %v168_v54 = vshll.u32 %v159_v43, %v166_v50  ;;  %v218_v43 = vpop.permute.xlu0 %217 }
  0xea   :  { %v224_v47 = vmul.f32 %v521_v42, %v218_v43 }
  0xeb   :  { %v169_v55 = vshrl.u32 %v151_v51, %v167_v52  ;;  %v172_v56 = vadd.s32 127, %v171_v53  ;;  %v523_v53 = vld [vmem:[%s1061_s4] ss:$0 sm:$0xff] }
  0xed   :  { %v170_v57 = vor.u32 %v169_v55, %v168_v54  ;;  %v173_v58 = vshll.u32 %v172_v56, 23 }
  0xef   :  { %v174_v59 = vor.u32 4788187, %v173_v58  ;;  %v177_v61 = vcvt.s32.f32 %v170_v57  ;;  %v419_v57 = vld [vmem:[#allocation6 + $0x50] sm:$0xff]  ;;  %v420_v58 = vld [vmem:[#allocation6 + $0x58] sm:$0xff] }
  0xf1   :  { %v175_v60 = vand.u32 2147483647, %v174_v59  ;;  %v746_v59 = vpack.c.bf16 %v420_v58, %v419_v57 }
  0xf3   :  { %v178_v62 = vmul.f32 %v177_v61, %v175_v60  ;;  %v421_v60 = vld [vmem:[#allocation6 + $0x60] sm:$0xff]  ;;  %v422_v61 = vld [vmem:[#allocation6 + $0x68] sm:$0xff] }
  0xf5   :  { %v179_v0 = vxor.u32 2147483648, %v178_v62 }
  0xf7   :  { %v180_v2 = vsel %vm97_vm8, %v179_v0, %v178_v62  ;;  %v749_v62 = vpack.c.bf16 %v422_v61, %v421_v60  ;;  %v424_v0 = vld [vmem:[#allocation6 + $0x78] sm:$0xff] }
  0xf8   :  { %v183_v4 = vsel %vm96_vm9, %v1011_v46, %v180_v2  ;;  %v329_v46 = vld [vmem:[#allocation4 + $0x70] sm:$0xff]  ;;  %v752_v2 = vpack.c.bf16 %v424_v0, %v423_v63 }
  0xf9   :  { %781 = vcosq.f32 %v183_v4  ;;  %v728_v27 = vpack.c.bf16 %v330_v26, %v329_v46 }
  0xfa   :  { %783 = vsinq.f32 %v183_v4  ;;  %v524_v4 = vld [vmem:[%s1063_s6] ss:$0 sm:$0xff] }
  0xfb   :  { %729 = vmatpush3.bf16.msra.mxu1 %v728_v27 }
 0x103   :  { %v782_v10 = vpop.eup %781 }
 0x104   :  { %v784_v11 = vpop.eup %783  ;;  %v195_v12 = vxor.u32 2147483648, %v782_v10 }
 0x105   :  { %v192_v13 = vxor.u32 2147483648, %v784_v11 }
 0x106   :  { %v196_v14 = vsel %vm194_vm10, %v195_v12, %v784_v11 }
 0x107   :  { %v193_v15 = vsel %vm191_vm11, %v782_v10, %v192_v13 }
 0x108   :  { %v197_v48 = vsel %vm190_vm12, %v193_v15, %v196_v14 }
 0x109   :  { %v198_v16 = vsel %vm187_vm13, nan, %v197_v48 }
 0x10a   :  { %610 = vmatmul.mubr.f32.vlgmr.msra.gmra.mrb[0].mxu0 %v198_v16 }
 0x10b   :  { %679 = vmatprep.mubr.msk.f32.mxu0 %vm866_vm0, %v867_v8  ;;  %v409_v8 = vld [vmem:[#allocation6] sm:$0xff] }
 0x10c   :  { %v731_v30 = vpack.c.bf16 %v410_v28, %v409_v8 }
 0x10e   :  { %732 = vmatpush3.bf16.msra.mxu0 %v731_v30 }
 0x10f   :  { %733 = vmatprep.subr.bf16.mxu0 %v865_v5 }
 0x112   :  { %735 = vmatpush3.bf16.msra.mxu0 %v734_v32 }
 0x113   :  { %736 = vmatprep.subr.bf16.mxu0 %v865_v5 }
 0x116   :  { %738 = vmatpush3.bf16.msra.mxu0 %v737_v35 }
 0x117   :  { %739 = vmatprep.subr.bf16.mxu0 %v865_v5 }
 0x11a   :  { %741 = vmatpush3.bf16.msra.mxu0 %v740_v38 }
 0x11b   :  { %742 = vmatprep.subr.bf16.mxu0 %v865_v5 }
 0x11e   :  { %744 = vmatpush3.bf16.msra.mxu0 %v743_v41 }
 0x11f   :  { %745 = vmatprep.subr.bf16.mxu0 %v865_v5 }
 0x122   :  { %747 = vmatpush3.bf16.msra.mxu0 %v746_v59 }
 0x123   :  { %748 = vmatprep.subr.bf16.mxu0 %v865_v5 }
 0x126   :  { %750 = vmatpush3.bf16.msra.mxu0 %v749_v62 }
 0x127   :  { %751 = vmatprep.subr.bf16.mxu0 %v865_v5  ;;  %v525_v5 = vld [vmem:[%s1065_s8] ss:$0 sm:$0xff] }
 0x12a   :  { %753 = vmatpush3.bf16.msra.mxu0 %v752_v2 }
 0x15f   :  { %v504_v12 = vpop.permute.xlu1 %503 }
 0x1dd   :  { %v291_v50 = vpop.f32.mrb[0].mxu0 }
 0x1de   :  { %v292_v51 = vadd.f32 %v291_v50, %v224_v47  ;;  %v611_v52 = vpop.f32.mrb[1].mxu0 }
 0x1e0   :  { %v305_v54 = vadd.f32 %v304_v49, %v292_v51 }
 0x1e2   :  { %v313_v55 = vadd.f32 %v523_v53, %v305_v54 }
 0x1e4   :  { %785 = vtanh.f32 %v313_v55 }
 0x1ee   :  { %v786_v56 = vpop.eup %785 }
 0x1ef   :  { %645 = vmatmul.mubr.f32.vlgmr.msra.gmra.mrb[0].mxu1 %v786_v56 }
 0x2c2   :  { %v404_v6 = vpop.f32.mrb[0].mxu1 }
 0x2c3   :  { %v405_v7 = vadd.f32 %v524_v4, %v404_v6  ;;  %v646_v9 = vpop.f32.mrb[1].mxu1 }
 0x2c5   :  { %787 = vtanh.f32 %v405_v7 }
 0x2cf   :  { %v788_v10 = vpop.eup %787 }
 0x2d0   :  { %680 = vmatmul.mubr.f32.vlgmr.msra.gmra.mrb[2].mxu0 %v788_v10 }
 0x3a3   :  { %v498_v11 = vpop.f32.mrb[2].mxu0 }
 0x3a4   :  { %v499_v13 = vadd.f32 %v525_v5, %v498_v11  ;;  %v681_v14 = vpop.f32.mrb[3].mxu0 }
 0x3a6   :  { %v506_v1 = vmul.f32 %v504_v12, %v499_v13 }
 0x3a8   :  { %508 = vst.msk [vmem:[%s1066_s9] sm:$0xff] %vm507_vm14, %v506_v1 }
 0x3a9   :  { %513 = vsyncpa [#allocation3], 1 }
 0x3aa   :  { %514 = vsyncpa [#allocation5], 1 }

</bundles_post_ra>
